<compile_context>
chip_gen: v7x
topology: tpu7x:2x2x1
jax: 0.10.0
libtpu: 0.0.40
codegen_flags: <defaults>
</compile_context>

<pallas_src>
import math

import jax
import jax.numpy as jnp
from jax import lax
from jax.experimental import pallas as pl
from jax.experimental.pallas import tpu as pltpu

_INV_SQRT2 = 1.0 / math.sqrt(2.0)
_MiB = 1024 * 1024


def _round_up(x, m):
    return ((x + m - 1) // m) * m


def _cdiv(a, b):
    return (a + b - 1) // b


def _gelu_exact_f32(h):
    # PyTorch nn.GELU default (approximate='none'), computed in f32.
    return 0.5 * h * (1.0 + lax.erf(h * _INV_SQRT2))


# ----------------------------- kernels --------------------------------------


def _mlp_kernel_resident(x_ref, w1_ref, b1_ref, w2_ref, b2_ref, o_ref):
    """Weights fully resident in VMEM: one grid step per M tile, no reduction."""
    x = x_ref[...]
    h = jnp.dot(x, w1_ref[...], preferred_element_type=jnp.float32)
    h = _gelu_exact_f32(h + b1_ref[...].astype(jnp.float32))
    # drop1 (p=0) and norm (Identity) are no-ops.
    out = jnp.dot(h.astype(x.dtype), w2_ref[...],
                  preferred_element_type=jnp.float32)
    out = out + b2_ref[...].astype(jnp.float32)
    # drop2 (p=0) is a no-op.
    o_ref[...] = out.astype(o_ref.dtype)


def _mlp_kernel_htiled(x_ref, w1_ref, b1_ref, w2_ref, b2_ref, o_ref, acc_ref):
    """H is an 'arbitrary' reduction axis; fc2 partials accumulate in f32 scratch."""
    j = pl.program_id(1)
    x = x_ref[...]
    h = jnp.dot(x, w1_ref[...], preferred_element_type=jnp.float32)
    h = _gelu_exact_f32(h + b1_ref[...].astype(jnp.float32))
    part = jnp.dot(h.astype(x.dtype), w2_ref[...],
                   preferred_element_type=jnp.float32)

    @pl.when(j == 0)
    def _first():
        # Write directly on the first step (no zero-init read-modify-write).
        acc_ref[...] = part

    @pl.when(j > 0)
    def _accum():
        acc_ref[...] += part

    @pl.when(j == pl.num_programs(1) - 1)
    def _finalize():
        o_ref[...] = (acc_ref[...] + b2_ref[...].astype(jnp.float32)
                      ).astype(o_ref.dtype)


# ------------------------ tiling / hardware heuristics -----------------------


def _hw_defaults():
    """Generation-aware (tm_target, vmem_limit_bytes, multi_core)."""
    cap = 64 * _MiB
    try:
        cap = int(pltpu.get_tpu_info().vmem_capacity_bytes)
    except Exception:
        pass
    kind = ""
    try:
        kind = jax.devices()[0].device_kind.lower()
    except Exception:
        pass

    if ("v7" in kind) or cap <= 80 * _MiB:
        # v7x-class: 64 MiB VMEM per TC, 2 TCs/chip -> smaller tiles, keep the
        # parallel M axis split so both cores get work.
        return 512, min(48 * _MiB, (cap * 3) // 4), True
    if "v5" in kind:
        # v5e: weakest MXU, saturates compute at smaller tiles.
        return 512, 100 * _MiB, False
    # v6e-class: 128 MiB VMEM and the highest compute:HBM ratio -> big tiles.
    return 1024, 100 * _MiB, False


def _vmem_usage_bytes(tm, th, c_in_p, c_out_p, in_isz, out_isz, resident):
    """Conservative VMEM estimate (default double-buffering on every operand)."""
    b = 0
    b += 2 * tm * c_in_p * in_isz          # x tile
    b += 2 * c_in_p * th * in_isz          # w1 block
    b += 2 * 8 * th * in_isz               # b1 (sublane-padded)
    b += 2 * th * c_out_p * in_isz         # w2 block
    b += 2 * 8 * c_out_p * in_isz          # b2
    b += 2 * tm * c_out_p * out_isz        # output tile
    b += tm * th * 4                       # f32 GELU intermediate
    if not resident:
        b += tm * c_out_p * 4              # f32 accumulator scratch
    return b


def _tm_candidates(tm_max):
    tm = tm_max
    while True:
        yield tm
        if tm <= 8:
            return
        tm = max(8, _round_up(tm // 2, 8))


def _select_tiles(m, c_in_p, h_p, c_out_p, in_isz, out_isz,
                  tm_target, budget, multi_core):
    tm_max = _round_up(min(tm_target, _round_up(m, 8)), 8)
    if multi_core and m > 256 and _cdiv(m, tm_max) < 2:
        # Keep both v7x TensorCores busy along the parallel M axis.
        tm_max = max(8, _round_up(_cdiv(m, 2), 8))

    # 1) Weights-resident fast path: th == H_p, weights fetched once, single j.
    min_resident_tm = min(tm_max, 256)
    for tm in _tm_candidates(tm_max):
        if tm < min_resident_tm:
            break
        if _vmem_usage_bytes(tm, h_p, c_in_p, c_out_p, in_isz, out_isz,
                             True) <= budget:
            return tm, h_p, True

    # 2) H-tiled reduction fallback (very large H / f32 weights / small VMEM).
    for th in (1024, 512, 256, 128):
        if th > h_p:
            continue
        for tm in _tm_candidates(tm_max):
            if _vmem_usage_bytes(tm, th, c_in_p, c_out_p, in_isz, out_isz,
                                 False) <= budget:
                return tm, th, False
    return 8, 128, False


# ------------------------------ wrapper --------------------------------------


def mlp_pallas(x, w1, b1, w2, b2, *, tile_m=None, tile_h=None,
               vmem_limit_bytes=None):
    """Fused MLP forward.

    x:  (B, N, C_in)           tokens, channels-last (nn.Linear convention)
    w1: (C_in, H)    b1: (H,)  fc1 (pre-transposed)
    w2: (H, C_out)   b2: (C_out,)
    Returns (B, N, C_out) in x.dtype.
    """
    B, N, C_in = x.shape
    H = w1.shape[1]
    C_out = w2.shape[1]
    M = B * N
    out_dtype = x.dtype

    tm_target, vmem_default, multi_core = _hw_defaults()
    if vmem_limit_bytes is None:
        vmem_limit_bytes = vmem_default
    if tile_m is not None:
        tm_target = tile_m

    # Lane-dense channel dims (full MXU tiles, unmasked vst on the output).
    C_in_p = _round_up(C_in, 128)
    C_out_p = _round_up(C_out, 128)
    H_p = _round_up(H, 128)

    in_isz = jnp.dtype(x.dtype).itemsize
    out_isz = jnp.dtype(out_dtype).itemsize
    budget = int(0.8 * vmem_limit_bytes)

    if tile_h is None:
        tm, th, resident = _select_tiles(M, C_in_p, H_p, C_out_p, in_isz,
                                         out_isz, tm_target, budget, multi_core)
    else:
        th = _round_up(min(tile_h, H_p), 128)
        tm = _round_up(min(tm_target, _round_up(M, 8)), 8)
        resident = th >= H_p

    M_p = _round_up(M, tm)
    H_p = _round_up(H_p, th)

    # Zero-pad operands only when needed (exact: padded rows/cols contribute
    # nothing; b1 padded with zeros -> GELU(0)=0 in padded hidden columns).
    # NOTE: in a real model the weight/bias pads would be done once at
    # parameter setup rather than per forward call.
    x2 = x.reshape(M, C_in)
    if (M_p != M) or (C_in_p != C_in):
        x2 = jnp.pad(x2, ((0, M_p - M), (0, C_in_p - C_in)))
    w1_p = w1 if (C_in_p == C_in and H_p == H) else jnp.pad(
        w1, ((0, C_in_p - C_in), (0, H_p - H)))
    b1_p = (b1 if H_p == H else jnp.pad(b1, (0, H_p - H))).reshape(1, H_p)
    w2_p = w2 if (H_p == H and C_out_p == C_out) else jnp.pad(
        w2, ((0, H_p - H), (0, C_out_p - C_out)))
    b2_p = (b2 if C_out_p == C_out else jnp.pad(
        b2, (0, C_out_p - C_out))).reshape(1, C_out_p)

    n_m = M_p // tm
    flops = 2 * M_p * (C_in_p * H_p + H_p * C_out_p)
    weight_bytes = (w1_p.size + w2_p.size) * in_isz
    bias_bytes = (b1_p.size + b2_p.size) * in_isz
    out_bytes = M_p * C_out_p * out_isz
    x_bytes = x2.size * in_isz

    if resident:
        # Weights fetched once for the whole call (block index constant).
        cost = pl.CostEstimate(
            flops=flops, transcendentals=M_p * H_p,
            bytes_accessed=x_bytes + weight_bytes + bias_bytes + out_bytes)
        out2 = pl.pallas_call(
            _mlp_kernel_resident,
            out_shape=jax.ShapeDtypeStruct((M_p, C_out_p), out_dtype),
            grid_spec=pltpu.PrefetchScalarGridSpec(
                num_scalar_prefetch=0,
                grid=(n_m,),
                in_specs=[
                    pl.BlockSpec((tm, C_in_p), lambda i: (i, 0)),     # x tile
                    pl.BlockSpec((C_in_p, H_p), lambda i: (0, 0)),    # w1 (resident)
                    pl.BlockSpec((1, H_p), lambda i: (0, 0)),         # b1 (resident)
                    pl.BlockSpec((H_p, C_out_p), lambda i: (0, 0)),   # w2 (resident)
                    pl.BlockSpec((1, C_out_p), lambda i: (0, 0)),     # b2 (resident)
                ],
                out_specs=pl.BlockSpec((tm, C_out_p), lambda i: (i, 0)),
            ),
            compiler_params=pltpu.CompilerParams(
                dimension_semantics=("parallel",),
                vmem_limit_bytes=int(vmem_limit_bytes)),
            cost_estimate=cost,
        )(x2, w1_p, b1_p, w2_p, b2_p)
    else:
        # H-tiled reduction: weights are re-streamed once per M tile.
        cost = pl.CostEstimate(
            flops=flops, transcendentals=M_p * H_p,
            bytes_accessed=(x_bytes + out_bytes + b2_p.size * in_isz
                            + n_m * (weight_bytes + b1_p.size * in_isz)))
        out2 = pl.pallas_call(
            _mlp_kernel_htiled,
            out_shape=jax.ShapeDtypeStruct((M_p, C_out_p), out_dtype),
            grid_spec=pltpu.PrefetchScalarGridSpec(
                num_scalar_prefetch=0,
                grid=(n_m, H_p // th),
                in_specs=[
                    pl.BlockSpec((tm, C_in_p), lambda i, j: (i, 0)),   # x tile
                    pl.BlockSpec((C_in_p, th), lambda i, j: (0, j)),   # w1 hidden blk
                    pl.BlockSpec((1, th), lambda i, j: (0, j)),        # b1 hidden blk
                    pl.BlockSpec((th, C_out_p), lambda i, j: (j, 0)),  # w2 hidden blk
                    pl.BlockSpec((1, C_out_p), lambda i, j: (0, 0)),   # b2
                ],
                out_specs=pl.BlockSpec((tm, C_out_p), lambda i, j: (i, 0)),
                scratch_shapes=[pltpu.VMEM((tm, C_out_p), jnp.float32)],
            ),
            compiler_params=pltpu.CompilerParams(
                dimension_semantics=("parallel", "arbitrary"),
                vmem_limit_bytes=int(vmem_limit_bytes)),
            cost_estimate=cost,
        )(x2, w1_p, b1_p, w2_p, b2_p)

    if (M_p != M) or (C_out_p != C_out):
        out2 = out2[:M, :C_out]
    return out2.reshape(B, N, C_out)


# ------------------------------ reference ------------------------------------


def mlp_reference(x, w1, b1, w2, b2):
    h = jnp.dot(x, w1, precision=lax.Precision.HIGHEST) + b1
    h = 0.5 * h * (1.0 + lax.erf(h * _INV_SQRT2))
    return jnp.dot(h, w2, precision=lax.Precision.HIGHEST) + b2


def _make_params(key, c_in, h, c_out, dtype=jnp.float32):
    k1, k2, k3, k4 = jax.random.split(key, 4)
    lim1 = 1.0 / math.sqrt(c_in)
    lim2 = 1.0 / math.sqrt(h)
    w1 = jax.random.uniform(k1, (c_in, h), minval=-lim1, maxval=lim1, dtype=dtype)
    b1 = jax.random.uniform(k2, (h,), minval=-lim1, maxval=lim1, dtype=dtype)
    w2 = jax.random.uniform(k3, (h, c_out), minval=-lim2, maxval=lim2, dtype=dtype)
    b2 = jax.random.uniform(k4, (c_out,), minval=-lim2, maxval=lim2, dtype=dtype)
    return w1, b1, w2, b2


if __name__ == "__main__":
    # Small shapes consistent with the module: tokens (B, N, C_in).
    B, N = 2, 8
    in_f, hid_f, out_f = 16, 32, 16

    key = jax.random.PRNGKey(0)
    kx, kp, kp2 = jax.random.split(key, 3)

    x = jax.random.normal(kx, (B, N, in_f), dtype=jnp.float32)
    w1, b1, w2, b2 = _make_params(kp, in_f, hid_f, out_f)

    y_ref = mlp_reference(x, w1, b1, w2, b2)

    # f32 path (weights-resident fast path).  Tolerance covers possible
    # reduced-precision MXU passes for f32 matmuls.
    y = jax.block_until_ready(mlp_pallas(x, w1, b1, w2, b2))
    assert y.shape == (B, N, out_f)
    assert jnp.allclose(y, y_ref, atol=2e-2, rtol=2e-2)

    # bf16 MXU fast path (weights/activations bf16, f32 accumulation inside the
    # kernel); loose tolerance since inputs are rounded to bf16.
    bf16 = jnp.bfloat16
    y_bf16 = jax.block_until_ready(
        mlp_pallas(x.astype(bf16), w1.astype(bf16), b1.astype(bf16),
                   w2.astype(bf16), b2.astype(bf16)))
    assert y_bf16.shape == (B, N, out_f)
    assert jnp.allclose(y_bf16.astype(jnp.float32), y_ref, atol=1e-1, rtol=1e-1)

    # Exercise the H-tiled reduction fallback explicitly (tile_h < H_p).
    hid_big = 256
    w1b, b1b, w2b, b2b = _make_params(kp2, in_f, hid_big, out_f)
    y_ref_b = mlp_reference(x, w1b, b1b, w2b, b2b)
    y_b = jax.block_until_ready(mlp_pallas(x, w1b, b1b, w2b, b2b, tile_h=128))
    assert y_b.shape == (B, N, out_f)
    assert jnp.allclose(y_b, y_ref_b, atol=2e-2, rtol=2e-2)

    print("KERNEL_OK")
</pallas_src>

<mosaic_0001>
module attributes {stable_mosaic.version = 11 : i64} {
  func.func @_mlp_kernel_resident(%arg0: i32, %arg1: memref<16x128xf32, #tpu.memory_space<vmem>>, %arg2: memref<128x128xf32, #tpu.memory_space<vmem>>, %arg3: memref<1x128xf32, #tpu.memory_space<vmem>>, %arg4: memref<128x128xf32, #tpu.memory_space<vmem>>, %arg5: memref<1x128xf32, #tpu.memory_space<vmem>>, %arg6: memref<16x128xf32, #tpu.memory_space<vmem>>) attributes {dimension_semantics = [#tpu.dimension_semantics<parallel>], iteration_bounds = array<i64: 1>, scalar_prefetch = 0 : i64, scratch_operands = 0 : i64, tpu.core_type = #tpu.core_type<tc>, window_params = [{transform_indices = @transform_0, window_bounds = array<i64: 16, 128>}, {pipeline_mode = #tpu.pipeline_mode<synchronous>, transform_indices = @transform_1, window_bounds = array<i64: 128, 128>}, {pipeline_mode = #tpu.pipeline_mode<synchronous>, transform_indices = @transform_2, window_bounds = array<i64: 1, 128>}, {pipeline_mode = #tpu.pipeline_mode<synchronous>, transform_indices = @transform_3, window_bounds = array<i64: 128, 128>}, {pipeline_mode = #tpu.pipeline_mode<synchronous>, transform_indices = @transform_4, window_bounds = array<i64: 1, 128>}, {transform_indices = @transform_5, window_bounds = array<i64: 16, 128>}]} {
    %c0 = arith.constant 0 : index
    %c0_0 = arith.constant 0 : index
    %0 = vector.load %arg1[%c0, %c0_0] : memref<16x128xf32, #tpu.memory_space<vmem>>, vector<16x128xf32>
    %c0_1 = arith.constant 0 : index
    %c0_2 = arith.constant 0 : index
    %1 = vector.load %arg2[%c0_1, %c0_2] : memref<128x128xf32, #tpu.memory_space<vmem>>, vector<128x128xf32>
    %cst = arith.constant dense<0.000000e+00> : vector<16x128xf32>
    %2 = tpu.matmul %0, %1, %cst {dimension_numbers = #tpu.dot_dimension_numbers<[1], [0], [0], [1], [0, 0, 1, 1], [], []>} : vector<16x128xf32>, vector<128x128xf32>, vector<16x128xf32> -> vector<16x128xf32>
    %c0_3 = arith.constant 0 : index
    %c0_4 = arith.constant 0 : index
    %3 = vector.load %arg3[%c0_3, %c0_4] : memref<1x128xf32, #tpu.memory_space<vmem>>, vector<1x128xf32>
    %4 = vector.broadcast %3 : vector<1x128xf32> to vector<16x128xf32>
    %5 = arith.addf %2, %4 : vector<16x128xf32>
    %cst_5 = arith.constant 5.000000e-01 : f32
    %6 = vector.broadcast %cst_5 : f32 to vector<16x128xf32>
    %7 = arith.mulf %6, %5 : vector<16x128xf32>
    %cst_6 = arith.constant 0.707106769 : f32
    %8 = vector.broadcast %cst_6 : f32 to vector<16x128xf32>
    %9 = arith.mulf %5, %8 : vector<16x128xf32>
    %10 = math.erf %9 : vector<16x128xf32>
    %cst_7 = arith.constant 1.000000e+00 : f32
    %11 = vector.broadcast %cst_7 : f32 to vector<16x128xf32>
    %12 = arith.addf %11, %10 : vector<16x128xf32>
    %13 = arith.mulf %7, %12 : vector<16x128xf32>
    %c0_8 = arith.constant 0 : index
    %c0_9 = arith.constant 0 : index
    %14 = vector.load %arg4[%c0_8, %c0_9] : memref<128x128xf32, #tpu.memory_space<vmem>>, vector<128x128xf32>
    %cst_10 = arith.constant dense<0.000000e+00> : vector<16x128xf32>
    %15 = tpu.matmul %13, %14, %cst_10 {dimension_numbers = #tpu.dot_dimension_numbers<[1], [0], [0], [1], [0, 0, 1, 1], [], []>} : vector<16x128xf32>, vector<128x128xf32>, vector<16x128xf32> -> vector<16x128xf32>
    %c0_11 = arith.constant 0 : index
    %c0_12 = arith.constant 0 : index
    %16 = vector.load %arg5[%c0_11, %c0_12] : memref<1x128xf32, #tpu.memory_space<vmem>>, vector<1x128xf32>
    %17 = vector.broadcast %16 : vector<1x128xf32> to vector<16x128xf32>
    %18 = arith.addf %15, %17 : vector<16x128xf32>
    %c0_13 = arith.constant 0 : index
    %c0_14 = arith.constant 0 : index
    %19 = vector.load %arg6[%c0_13, %c0_14] : memref<16x128xf32, #tpu.memory_space<vmem>>, vector<16x128xf32>
    tpu.vector_store %arg6[%c0_13, %c0_14], %18 {strides = array<i32>} : memref<16x128xf32, #tpu.memory_space<vmem>>, vector<16x128xf32>,
    return
  }
  func.func @transform_0(%arg0: i32) -> (i32, i32) {
    %c0_i32 = arith.constant 0 : i32
    %c0_i32_0 = arith.constant 0 : i32
    return %arg0, %c0_i32 : i32, i32
  }
  func.func @transform_1(%arg0: i32) -> (i32, i32) {
    %c0_i32 = arith.constant 0 : i32
    %c0_i32_0 = arith.constant 0 : i32
    %c0_i32_1 = arith.constant 0 : i32
    return %c0_i32, %c0_i32_0 : i32, i32
  }
  func.func @transform_2(%arg0: i32) -> (i32, i32) {
    %c0_i32 = arith.constant 0 : i32
    %c0_i32_0 = arith.constant 0 : i32
    %c0_i32_1 = arith.constant 0 : i32
    return %c0_i32, %c0_i32_0 : i32, i32
  }
  func.func @transform_3(%arg0: i32) -> (i32, i32) {
    %c0_i32 = arith.constant 0 : i32
    %c0_i32_0 = arith.constant 0 : i32
    %c0_i32_1 = arith.constant 0 : i32
    return %c0_i32, %c0_i32_0 : i32, i32
  }
  func.func @transform_4(%arg0: i32) -> (i32, i32) {
    %c0_i32 = arith.constant 0 : i32
    %c0_i32_0 = arith.constant 0 : i32
    %c0_i32_1 = arith.constant 0 : i32
    return %c0_i32, %c0_i32_0 : i32, i32
  }
  func.func @transform_5(%arg0: i32) -> (i32, i32) {
    %c0_i32 = arith.constant 0 : i32
    %c0_i32_0 = arith.constant 0 : i32
    return %arg0, %c0_i32 : i32, i32
  }
}

</mosaic_0001>

<bundles_post_ra>
// kernel: tpu_custom_call.1
= control target key start
LH: loop header
LB: loop body
LE: loop exit
PB: predicated region body
PF: predicated region fallthrough
CT: control target
= control target key end

     0   :  { %10 = vsyncpa [#allocation3], 0  ;;  %s675_s0 = inlined_call_operand.hbm [shape: f32[16,128], index: 0, kind: input, shape index: {}]   ;;  %s676_s1 = inlined_call_operand.hbm [shape: f32[128,128], index: 1, kind: input, shape index: {}]   ;;  %s677_s2 = inlined_call_operand.vmem [shape: f32[1,128], index: 2, kind: input, shape index: {}]   ;;  %s678_s3 = inlined_call_operand.hbm [shape: f32[128,128], index: 3, kind: input, shape index: {}]   ;;  %s679_s4 = inlined_call_operand.vmem [shape: f32[1,128], index: 4, kind: input, shape index: {}]   ;;  %s680_s5 = inlined_call_operand.hbm [shape: f32[16,128], index: 5, kind: output, shape index: {}]  }
   0x1   :  { %11 = vsyncpa [#allocation6], 0 }
   0x2   :  { %12 = vsyncpa [#allocation4], 0  ;;  %s566_s18 = smov [#allocation5]   ;;  %s567_s20 = smov [#allocation2]  }
   0x3   :  { %s30_s19 = sshll.u32 %s566_s18, 4  ;;  %s18_s21 = sshll.u32 %s567_s20, 4  ;;  %s31_s19 = int_to_ptr.vmem [resolvable:$true] %s30_s19  ;;  %s602_s21 = int_to_ptr.vmem [resolvable:$true] %s18_s21 }
   0x4   :  { %s472_s24 = scalar_lea.hbm %s676_s1, 2048 }
   0x5   :  { %p473_p0 = scmp.ne.s32.totalorder %s676_s1, %s472_s24  ;;  %p476_p1 = scmp.lt.u32.totalorder %s472_s24, %s676_s1 }
   0x7   :  { %p478_p2 = pnand %p476_p1, %p473_p0 }
   0x9   :  { %481 = shalt.err (!%p478_p2)
}
   0xa   :  { %s482_s29 = scalar_lea.vmem %s31_s19, 2048  ;;  %p487_p4 = scmp.lt.s32.totalorder %s31_s19, %s31_s19 }
   0xb   :  { %p483_p3 = scmp.ne.s32.totalorder %s31_s19, %s482_s29  ;;  %p488_p5 = scmp.lt.s32.totalorder %s482_s29, %s482_s29 }
   0xd   :  { %p489_p6 = por %p488_p5, %p487_p4 }
   0xf   :  { %p490_p7 = pnand %p489_p6, %p483_p3 }
  0x11   :  { %493 = shalt.err (!%p490_p7)
}
  0x12   :  { %s568_s30 = smov 128   ;;  %s569_s6 = smov 8  }
  0x13   :  { %36 = dma.hbm_to_vmem [thread:$0]  %s676_s1, 2048, %s31_s19, [#allocation6], %s568_s30, %s568_s30, %s569_s6  }
  0x14   :  { %s494_s11 = scalar_lea.hbm %s675_s0, 256 }
  0x15   :  { %p495_p8 = scmp.ne.s32.totalorder %s675_s0, %s494_s11  ;;  %p498_p9 = scmp.lt.u32.totalorder %s494_s11, %s675_s0 }
  0x17   :  { %p500_p10 = pnand %p498_p9, %p495_p8 }
  0x19   :  { %503 = shalt.err (!%p500_p10)
}
  0x1a   :  { %s504_s16 = scalar_lea.vmem %s602_s21, 256  ;;  %p509_p12 = scmp.lt.s32.totalorder %s602_s21, %s602_s21 }
  0x1b   :  { %p505_p11 = scmp.ne.s32.totalorder %s602_s21, %s504_s16  ;;  %p510_p13 = scmp.lt.s32.totalorder %s504_s16, %s504_s16 }
  0x1d   :  { %p511_p0 = por %p510_p13, %p509_p12 }
  0x1f   :  { %p512_p1 = pnand %p511_p0, %p505_p11 }
  0x21   :  { %515 = shalt.err (!%p512_p1)
}
  0x22   :  { %24 = dma.hbm_to_vmem [thread:$0]  %s675_s0, 256, %s602_s21, [#allocation3], %s568_s30, %s568_s30, %s569_s6  }
  0x23   :  { %s570_s18 = smov [#allocation7]   ;;  %s516_s23 = scalar_lea.hbm %s678_s3, 2048 }
  0x24   :  { %s44_s19 = sshll.u32 %s570_s18, 4  ;;  %p517_p2 = scmp.ne.s32.totalorder %s678_s3, %s516_s23  ;;  %s45_s19 = int_to_ptr.vmem [resolvable:$true] %s44_s19 }
  0x25   :  { %p520_p3 = scmp.lt.u32.totalorder %s516_s23, %s678_s3 }
  0x27   :  { %p522_p4 = pnand %p520_p3, %p517_p2 }
  0x29   :  { %525 = shalt.err (!%p522_p4)
}
  0x2a   :  { %s526_s28 = scalar_lea.vmem %s45_s19, 2048  ;;  %p531_p6 = scmp.lt.s32.totalorder %s45_s19, %s45_s19 }
  0x2b   :  { %p527_p5 = scmp.ne.s32.totalorder %s45_s19, %s526_s28  ;;  %p532_p7 = scmp.lt.s32.totalorder %s526_s28, %s526_s28 }
  0x2d   :  { %p533_p8 = por %p532_p7, %p531_p6 }
  0x2f   :  { %p534_p9 = pnand %p533_p8, %p527_p5 }
  0x31   :  { %537 = shalt.err (!%p534_p9)
}
  0x32   :  { %50 = dma.hbm_to_vmem [thread:$0]  %s678_s3, 2048, %s45_s19, [#allocation6], %s568_s30, %s568_s30, %s569_s6  }
  0x33   :  { %560 = dma.done.wait [#allocation3], 256  }
  0x34   :  { %561 = vsyncadd [#allocation3], 4294967040 }
  0x35   :  { %562 = dma.done.wait [#allocation6], 4096  }
  0x36   :  { %563 = vsyncadd [#allocation6], 4294963200  ;;  %v64_v0 = vld [vmem:[#allocation5] sm:$0xff]  ;;  %v65_v1 = vld [vmem:[#allocation5 + $0x8] sm:$0xff]  ;;  %s571_s8 = smov [#allocation8]  }
  0x37   :  { %v66_v2 = vld [vmem:[#allocation5 + $0x10] sm:$0xff]  ;;  %v398_v3 = vpack.c.bf16 %v65_v1, %v64_v0  ;;  %v67_v4 = vld [vmem:[#allocation5 + $0x18] sm:$0xff]  ;;  %v68_v6 = vld [vmem:[#allocation5 + $0x20] sm:$0xff]  ;;  %s277_s9 = sshll.u32 %s571_s8, 4  ;;  %s278_s9 = int_to_ptr.vmem [resolvable:$true] %s277_s9 }
  0x38   :  { %v402_v5 = vpack.c.bf16 %v67_v4, %v66_v2  ;;  %v69_v7 = vld [vmem:[#allocation5 + $0x28] sm:$0xff]  ;;  %v70_v9 = vld [vmem:[#allocation5 + $0x30] sm:$0xff]  ;;  %v71_v10 = vld [vmem:[#allocation5 + $0x38] sm:$0xff]  ;;  %s538_s10 = scalar_lea.vmem %s278_s9, 256  ;;  %p543_p11 = scmp.lt.s32.totalorder %s278_s9, %s278_s9 }
  0x39   :  { %399 = vmatprep.subr.bf16.mxu0 %v398_v3  ;;  %v406_v8 = vpack.c.bf16 %v69_v7, %v68_v6  ;;  %v62_v11 = vld [vmem:[#allocation2] sm:$0xff]  ;;  %v172_v12 = vld [vmem:[#allocation7] sm:$0xff]  ;;  %v173_v13 = vld [vmem:[#allocation7 + $0x8] sm:$0xff]  ;;  %v410_v20 = vpack.c.bf16 %v71_v10, %v70_v9  ;;  %p539_p10 = scmp.ne.s32.totalorder %s278_s9, %s538_s10  ;;  %p544_p12 = scmp.lt.s32.totalorder %s538_s10, %s538_s10 }
  0x3a   :  { %401 = vmatpush3.bf16.msra.mxu0 %v398_v3  ;;  %360 = vmatprep.mubr.f32.mxu0 %v62_v11  ;;  %v174_v14 = vld [vmem:[#allocation7 + $0x10] sm:$0xff]  ;;  %v430_v15 = vpack.c.bf16 %v173_v13, %v172_v12  ;;  %v175_v16 = vld [vmem:[#allocation7 + $0x18] sm:$0xff]  ;;  %v176_v18 = vld [vmem:[#allocation7 + $0x20] sm:$0xff] }
  0x3b   :  { %403 = vmatprep.subr.bf16.mxu0 %v402_v5  ;;  %v434_v17 = vpack.c.bf16 %v175_v16, %v174_v14  ;;  %v177_v19 = vld [vmem:[#allocation7 + $0x28] sm:$0xff]  ;;  %v72_v21 = vld [vmem:[#allocation5 + $0x40] sm:$0xff]  ;;  %v74_v25 = vld [vmem:[#allocation5 + $0x50] sm:$0xff]  ;;  %p545_p13 = por %p544_p12, %p543_p11 }
  0x3c   :  { %431 = vmatprep.subr.bf16.mxu1 %v430_v15  ;;  %v73_v22 = vld [vmem:[#allocation5 + $0x48] sm:$0xff]  ;;  %v438_v23 = vpack.c.bf16 %v177_v19, %v176_v18  ;;  %v75_v26 = vld [vmem:[#allocation5 + $0x58] sm:$0xff]  ;;  %v76_v28 = vld [vmem:[#allocation5 + $0x60] sm:$0xff] }
  0x3d   :  { %433 = vmatpush3.bf16.msra.mxu1 %v430_v15  ;;  %v414_v24 = vpack.c.bf16 %v73_v22, %v72_v21  ;;  %v418_v27 = vpack.c.bf16 %v75_v26, %v74_v25  ;;  %v77_v29 = vld [vmem:[#allocation5 + $0x68] sm:$0xff]  ;;  %v78_v31 = vld [vmem:[#allocation5 + $0x70] sm:$0xff]  ;;  %v79_v32 = vld [vmem:[#allocation5 + $0x78] sm:$0xff]  ;;  %p546_p0 = pnand %p545_p13, %p539_p10 }
  0x3e   :  { %405 = vmatpush3.bf16.msra.mxu0 %v402_v5  ;;  %435 = vmatprep.subr.bf16.mxu1 %v434_v17  ;;  %v422_v30 = vpack.c.bf16 %v77_v29, %v76_v28  ;;  %v426_v33 = vpack.c.bf16 %v79_v32, %v78_v31  ;;  %v63_v34 = vld [vmem:[#allocation2 + $0x8] sm:$0xff]  ;;  %v178_v35 = vld [vmem:[#allocation7 + $0x30] sm:$0xff]  ;;  %v180_v38 = vld [vmem:[#allocation7 + $0x40] sm:$0xff] }
  0x3f   :  { %407 = vmatprep.subr.bf16.mxu0 %v406_v8  ;;  %v179_v36 = vld [vmem:[#allocation7 + $0x38] sm:$0xff]  ;;  %v181_v39 = vld [vmem:[#allocation7 + $0x48] sm:$0xff]  ;;  %v182_v41 = vld [vmem:[#allocation7 + $0x50] sm:$0xff] }
  0x40   :  { %v442_v37 = vpack.c.bf16 %v179_v36, %v178_v35  ;;  %v446_v40 = vpack.c.bf16 %v181_v39, %v180_v38  ;;  %v183_v42 = vld [vmem:[#allocation7 + $0x58] sm:$0xff]  ;;  %v184_v44 = vld [vmem:[#allocation7 + $0x60] sm:$0xff]  ;;  %v185_v45 = vld [vmem:[#allocation7 + $0x68] sm:$0xff] }
  0x41   :  { %437 = vmatpush3.bf16.msra.mxu1 %v434_v17  ;;  %v450_v43 = vpack.c.bf16 %v183_v42, %v182_v41  ;;  %v454_v46 = vpack.c.bf16 %v185_v45, %v184_v44  ;;  %v186_v47 = vld [vmem:[#allocation7 + $0x70] sm:$0xff]  ;;  %v187_v48 = vld [vmem:[#allocation7 + $0x78] sm:$0xff] }
  0x42   :  { %409 = vmatpush3.bf16.msra.mxu0 %v406_v8  ;;  %439 = vmatprep.subr.bf16.mxu1 %v438_v23  ;;  %v458_v49 = vpack.c.bf16 %v187_v48, %v186_v47  ;;  %v290_v50 = vld [vmem:[%s677_s2] ss:$0 sm:$0xff] }
  0x43   :  { %411 = vmatprep.subr.bf16.mxu0 %v410_v20  ;;  %v291_v1 = vld [vmem:[%s679_s4] ss:$0 sm:$0xff] }
  0x45   :  { %441 = vmatpush3.bf16.msra.mxu1 %v438_v23 }
  0x46   :  { %413 = vmatpush3.bf16.msra.mxu0 %v410_v20  ;;  %443 = vmatprep.subr.bf16.mxu1 %v442_v37 }
  0x47   :  { %415 = vmatprep.subr.bf16.mxu0 %v414_v24 }
  0x49   :  { %445 = vmatpush3.bf16.msra.mxu1 %v442_v37 }
  0x4a   :  { %417 = vmatpush3.bf16.msra.mxu0 %v414_v24  ;;  %447 = vmatprep.subr.bf16.mxu1 %v446_v40 }
  0x4b   :  { %419 = vmatprep.subr.bf16.mxu0 %v418_v27 }
  0x4d   :  { %449 = vmatpush3.bf16.msra.mxu1 %v446_v40 }
  0x4e   :  { %421 = vmatpush3.bf16.msra.mxu0 %v418_v27  ;;  %451 = vmatprep.subr.bf16.mxu1 %v450_v43 }
  0x4f   :  { %423 = vmatprep.subr.bf16.mxu0 %v422_v30 }
  0x51   :  { %453 = vmatpush3.bf16.msra.mxu1 %v450_v43 }
  0x52   :  { %425 = vmatpush3.bf16.msra.mxu0 %v422_v30  ;;  %455 = vmatprep.subr.bf16.mxu1 %v454_v46 }
  0x53   :  { %427 = vmatprep.subr.bf16.mxu0 %v426_v33 }
  0x55   :  { %457 = vmatpush3.bf16.msra.mxu1 %v454_v46 }
  0x56   :  { %429 = vmatpush3.bf16.msra.mxu0 %v426_v33  ;;  %459 = vmatprep.subr.bf16.mxu1 %v458_v49 }
  0x59   :  { %361 = vmatmul.mubr.f32.vlgmr.msra.gmra.mrb[0].mxu0 %v63_v34  ;;  %461 = vmatpush3.bf16.msra.mxu1 %v458_v49 }
 0x12c   :  { %v362_v51 = vpop.f32.mrb[0].mxu0 }
 0x12d   :  { %v159_v52 = vadd.f32 %v362_v51, %v290_v50  ;;  %v153_v53 = vpop.f32.mrb[1].mxu0 }
 0x12e   :  { %v154_v54 = vadd.f32 %v290_v50, %v153_v53 }
 0x12f   :  { %v165_v55 = vmul.f32 0.70710677, %v159_v52  ;;  %v163_v62 = vmul.f32 0.5, %v159_v52 }
 0x130   :  { %v164_v56 = vmul.f32 0.70710677, %v154_v54  ;;  %v162_v60 = vmul.f32 0.5, %v154_v54 }
 0x131   :  { %468 = verf.f32 %v165_v55 }
 0x132   :  { %470 = verf.f32 %v164_v56 }
 0x13b   :  { %v469_v57 = vpop.eup %468 }
 0x13c   :  { %v471_v58 = vpop.eup %470  ;;  %v169_v59 = vadd.f32 1.0, %v469_v57 }
 0x13d   :  { %v168_v61 = vadd.f32 1.0, %v471_v58 }
 0x13e   :  { %v171_v0 = vmul.f32 %v169_v59, %v163_v62 }
 0x13f   :  { %v170_v63 = vmul.f32 %v168_v61, %v162_v60 }
 0x141   :  { %395 = vmatprep.mubr.f32.mxu1 %v170_v63 }
 0x142   :  { %396 = vmatmul.mubr.f32.vlgmr.msra.gmra.mrb[0].mxu1 %v171_v0 }
 0x215   :  { %v397_v2 = vpop.f32.mrb[0].mxu1 }
 0x216   :  { %v267_v3 = vadd.f32 %v397_v2, %v291_v1  ;;  %v261_v4 = vpop.f32.mrb[1].mxu1 }
 0x217   :  { %v262_v5 = vadd.f32 %v291_v1, %v261_v4 }
 0x218   :  { %271 = vst [vmem:[#allocation8 + $0x8] sm:$0xff] %v267_v3 }
 0x219   :  { %270 = vst [vmem:[#allocation8] sm:$0xff] %v262_v5 }
 0x21a   :  { %549 = shalt.err (!%p546_p0)
}
 0x21b   :  { %s550_s4 = scalar_lea.hbm %s680_s5, 256 }
 0x21c   :  { %p551_p1 = scmp.ne.s32.totalorder %s680_s5, %s550_s4  ;;  %p554_p2 = scmp.lt.u32.totalorder %s550_s4, %s680_s5 }
 0x21e   :  { %p556_p3 = pnand %p554_p2, %p551_p1 }
 0x220   :  { %559 = shalt.err (!%p556_p3)
}
 0x221   :  { %283 = dma.vmem_to_hbm [thread:$0]  %s278_s9, 256, %s680_s5, [#allocation4], %s568_s30, %s568_s30, %s569_s6  }
 0x222   :  { %564 = dma.done.wait [#allocation4], 256  }
 0x223   :  { %565 = vsyncadd [#allocation4], 4294967040 }
 0x224   :  { %287 = vsyncpa [#allocation3], 1 }
 0x225   :  { %288 = vsyncpa [#allocation6], 1 }
 0x226   :  { %289 = vsyncpa [#allocation4], 1 }

</bundles_post_ra>
